<compile_context>
chip_gen: v5e
topology: v5e:2x2
jax: 0.10.0
libtpu: 0.0.40
codegen_flags: <defaults>
</compile_context>

<pallas_src>
import jax
import jax.numpy as jnp
from jax import lax
from jax.experimental import pallas as pl
from jax.experimental.pallas import tpu as pltpu


def _round_up(a: int, m: int) -> int:
    return ((a + m - 1) // m) * m


def _projection_head_kernel(x_ref, w1_ref, b1_ref, w2_ref, o_ref):
    # x_ref : (tile_n, E)      row tile, compute dtype (bf16 by default)
    # w1_ref: (E, H_pad)       resident first-layer weight (compute dtype)
    # b1_ref: (1, H_pad)       resident bias, f32
    # w2_ref: (H_pad, P_out)   resident second-layer weight (compute dtype)
    # o_ref : (tile_n, P_out)  normalized projection tile

    # Linear 1 (MXU, f32 accumulate) + bias + ReLU in f32.
    h = jnp.dot(x_ref[...], w1_ref[...], preferred_element_type=jnp.float32)
    h = jnp.maximum(h + b1_ref[...], 0.0)

    # Linear 2 (bias=False); feed the MXU compute-dtype operands again.
    p = jnp.dot(h.astype(w2_ref.dtype), w2_ref[...],
                preferred_element_type=jnp.float32)

    # F.normalize(p=2, dim=-1): v / max(||v||, 1e-12) == v * rsqrt(max(sum_sq, 1e-24)).
    # One EUP rsqrt per row + broadcast VPU multiply (no sqrt + exact-divide chain).
    sum_sq = jnp.sum(p * p, axis=-1, keepdims=True)
    inv = lax.rsqrt(jnp.maximum(sum_sq, 1e-24))
    o_ref[...] = (p * inv).astype(o_ref.dtype)


def projection_head(x, w1, b1, w2, *, tile_n=512, compute_dtype=jnp.bfloat16):
    """x:(N,E), w1:(E,H), b1:(H,), w2:(H,P). Returns (N,P) L2-normalized rows (x.dtype)."""
    N, E = x.shape
    H = w1.shape[1]
    P = w2.shape[1]
    out_dtype = x.dtype

    # --- bf16 operands for the MXU; bias / accumulation / normalization stay f32. ---
    x_c = x.astype(compute_dtype)
    w1_c = w1.astype(compute_dtype)
    w2_c = w2.astype(compute_dtype)
    b1_f = b1.astype(jnp.float32)

    # --- Pad hidden dim to a lane multiple: zero W1 columns / b1 entries / W2 rows.
    #     ReLU(0 + 0) = 0, so padded hidden units contribute nothing. ---
    H_pad = _round_up(H, 128)
    if H_pad != H:
        w1_c = jnp.pad(w1_c, ((0, 0), (0, H_pad - H)))
        b1_f = jnp.pad(b1_f, (0, H_pad - H))
        w2_c = jnp.pad(w2_c, ((0, H_pad - H), (0, 0)))
    b1_f = b1_f.reshape(1, H_pad)

    # --- Output lane padding only when cheap (<= 2x output bytes). Zero-padded W2
    #     columns give zero outputs, which don't change the L2 norm. For tiny P a
    #     masked full-dim store beats writing 8x the bytes and slicing them off. ---
    P_lane = _round_up(P, 128)
    if P % 128 != 0 and P_lane <= 2 * P:
        P_out = P_lane
        w2_c = jnp.pad(w2_c, ((0, 0), (0, P_out - P)))
    else:
        P_out = P

    # --- Row tiling: dtype-aware sublane multiple (8 f32 / 16 bf16 / 32 int8|fp8). ---
    sub = {4: 8, 2: 16, 1: 32}.get(jnp.dtype(compute_dtype).itemsize, 8)
    tile_n = max(sub, _round_up(min(int(tile_n), _round_up(N, sub)), sub))
    # Give the v7x megacore (2 TCs) at least 2 grid steps when N allows it.
    if _round_up(N, tile_n) // tile_n < 2:
        half = _round_up(max(sub, (N + 1) // 2), sub)
        if half < tile_n and _round_up(N, half) // half >= 2:
            tile_n = half
    N_pad = _round_up(N, tile_n)
    if N_pad != N:
        x_c = jnp.pad(x_c, ((0, N_pad - N), (0, 0)))
    grid = (N_pad // tile_n,)

    # --- Explicit scoped-VMEM budget (defaults: 16 MiB v5e / 32 MiB v6e,v7x). Budget
    #     the worst case (double-buffered weights) + f32 intermediates + headroom,
    #     clamped so the request is valid on v7x's 64 MiB physical VMEM. ---
    cs = jnp.dtype(compute_dtype).itemsize
    osz = jnp.dtype(out_dtype).itemsize
    buf_bytes = (2 * tile_n * E * cs                                   # x tile (x2 bufs)
                 + 2 * (E * H_pad * cs + H_pad * 4 + H_pad * P_out * cs)  # weights/bias
                 + 2 * tile_n * P_out * osz                            # out tile (x2 bufs)
                 + tile_n * H_pad * 4 + tile_n * P_out * 4             # f32 h / p
                 + tile_n * H_pad * cs)                                # bf16 copy of h
    vmem_limit = min(max(int(1.5 * buf_bytes) + (4 << 20), 32 << 20), 64 << 20)

    cost = pl.CostEstimate(
        flops=2 * N_pad * (E * H_pad + H_pad * P_out),
        transcendentals=N_pad,  # one rsqrt per row
        bytes_accessed=(N_pad * E * cs + E * H_pad * cs + H_pad * 4
                        + H_pad * P_out * cs + N_pad * P_out * osz),
    )

    def build(single_buffer_weights):
        # Resident weights/bias have constant index_maps: single-buffer them so their
        # VMEM footprint is 1x instead of 2x (double-buffering buys nothing here).
        wkw = dict(pipeline_mode=pl.Buffered(1)) if single_buffer_weights else {}
        grid_spec = pltpu.PrefetchScalarGridSpec(
            num_scalar_prefetch=0,
            grid=grid,
            in_specs=[
                pl.BlockSpec((tile_n, E), lambda i: (i, 0)),             # x row tile
                pl.BlockSpec((E, H_pad), lambda i: (0, 0), **wkw),       # W1 resident
                pl.BlockSpec((1, H_pad), lambda i: (0, 0), **wkw),       # b1 resident
                pl.BlockSpec((H_pad, P_out), lambda i: (0, 0), **wkw),   # W2 resident
            ],
            out_specs=pl.BlockSpec((tile_n, P_out), lambda i: (i, 0)),
        )
        return pl.pallas_call(
            _projection_head_kernel,
            out_shape=jax.ShapeDtypeStruct((N_pad, P_out), out_dtype),
            grid_spec=grid_spec,
            compiler_params=pltpu.CompilerParams(
                dimension_semantics=("parallel",),   # independent row tiles
                vmem_limit_bytes=vmem_limit,
            ),
            cost_estimate=cost,
        )

    try:
        out = build(True)(x_c, w1_c, b1_f, w2_c)
    except Exception:
        # pipeline_mode unsupported in this JAX build: fall back to default
        # (double-buffered) resident weights; semantics are identical.
        out = build(False)(x_c, w1_c, b1_f, w2_c)

    return out[:N, :P]


def projection_head_ref(x, w1, b1, w2, compute_dtype=jnp.bfloat16):
    """Pure-JAX reference matching the kernel's mixed-precision path."""
    f32 = jnp.float32
    h = jnp.dot(x.astype(compute_dtype), w1.astype(compute_dtype),
                preferred_element_type=f32) + b1.astype(f32)
    h = jnp.maximum(h, 0.0)
    p = jnp.dot(h.astype(compute_dtype), w2.astype(compute_dtype),
                preferred_element_type=f32)
    n = jnp.sqrt(jnp.sum(p * p, axis=-1, keepdims=True))
    return p / jnp.maximum(n, 1e-12)


def projection_head_ref_f32(x, w1, b1, w2):
    """Full-precision reference (PyTorch fp32 module numerics)."""
    h = jnp.maximum(jnp.dot(x, w1, precision=lax.Precision.HIGHEST) + b1, 0.0)
    p = jnp.dot(h, w2, precision=lax.Precision.HIGHEST)
    n = jnp.sqrt(jnp.sum(p * p, axis=-1, keepdims=True))
    return p / jnp.maximum(n, 1e-12)


if __name__ == "__main__":
    # Small shapes consistent with the module:
    #   batch N=16, embed_dim=32, mlp_hidden_dim=64, projection_dim=16, attention=False.
    N, E, H, P = 16, 32, 64, 16

    key = jax.random.PRNGKey(0)
    kx, kw1, kb1, kw2 = jax.random.split(key, 4)
    x = jax.random.normal(kx, (N, E), dtype=jnp.float32)
    w1 = jax.random.normal(kw1, (E, H), dtype=jnp.float32) * (1.0 / jnp.sqrt(E))
    b1 = jax.random.normal(kb1, (H,), dtype=jnp.float32) * 0.01
    w2 = jax.random.normal(kw2, (H, P), dtype=jnp.float32) * (1.0 / jnp.sqrt(H))

    out = projection_head(x, w1, b1, w2)
    out = jax.block_until_ready(out)
    assert out.shape == (N, P)

    # Matches the mixed-precision (bf16-operand, f32-accumulate) reference tightly.
    ref = projection_head_ref(x, w1, b1, w2)
    assert jnp.allclose(out, ref, atol=1e-4, rtol=1e-4), "mismatch vs mixed-precision reference"

    # And the fp32 module numerics within bf16-induced tolerance.
    ref32 = projection_head_ref_f32(x, w1, b1, w2)
    assert jnp.allclose(out, ref32, atol=5e-2, rtol=5e-2), "mismatch vs fp32 reference"

    # Rows should be unit-norm (normalization is done in f32 inside the kernel).
    assert jnp.allclose(jnp.linalg.norm(out, axis=-1), 1.0, atol=1e-4)

    print("KERNEL_OK")
</pallas_src>

<mosaic_0001>
module attributes {stable_mosaic.version = 11 : i64} {
  func.func @_projection_head_kernel(%arg0: i32, %arg1: memref<16x32xbf16, #tpu.memory_space<vmem>>, %arg2: memref<32x128xbf16, #tpu.memory_space<vmem>>, %arg3: memref<1x128xf32, #tpu.memory_space<vmem>>, %arg4: memref<128x16xbf16, #tpu.memory_space<vmem>>, %arg5: memref<16x16xf32, #tpu.memory_space<vmem>>) attributes {dimension_semantics = [#tpu.dimension_semantics<parallel>], iteration_bounds = array<i64: 1>, scalar_prefetch = 0 : i64, scratch_operands = 0 : i64, tpu.core_type = #tpu.core_type<tc>, window_params = [{transform_indices = @transform_0, window_bounds = array<i64: 16, 32>}, {pipeline_mode = #tpu.pipeline_mode<synchronous>, transform_indices = @transform_1, window_bounds = array<i64: 32, 128>}, {pipeline_mode = #tpu.pipeline_mode<synchronous>, transform_indices = @transform_2, window_bounds = array<i64: 1, 128>}, {pipeline_mode = #tpu.pipeline_mode<synchronous>, transform_indices = @transform_3, window_bounds = array<i64: 128, 16>}, {transform_indices = @transform_4, window_bounds = array<i64: 16, 16>}]} {
    %c0 = arith.constant 0 : index
    %c0_0 = arith.constant 0 : index
    %0 = vector.load %arg1[%c0, %c0_0] : memref<16x32xbf16, #tpu.memory_space<vmem>>, vector<16x32xbf16>
    %c0_1 = arith.constant 0 : index
    %c0_2 = arith.constant 0 : index
    %1 = vector.load %arg2[%c0_1, %c0_2] : memref<32x128xbf16, #tpu.memory_space<vmem>>, vector<32x128xbf16>
    %cst = arith.constant dense<0.000000e+00> : vector<16x128xf32>
    %2 = tpu.matmul %0, %1, %cst {dimension_numbers = #tpu.dot_dimension_numbers<[1], [0], [0], [1], [0, 0, 1, 1], [], []>} : vector<16x32xbf16>, vector<32x128xbf16>, vector<16x128xf32> -> vector<16x128xf32>
    %c0_3 = arith.constant 0 : index
    %c0_4 = arith.constant 0 : index
    %3 = vector.load %arg3[%c0_3, %c0_4] : memref<1x128xf32, #tpu.memory_space<vmem>>, vector<1x128xf32>
    %4 = vector.broadcast %3 : vector<1x128xf32> to vector<16x128xf32>
    %5 = arith.addf %2, %4 : vector<16x128xf32>
    %cst_5 = arith.constant 0.000000e+00 : f32
    %6 = vector.broadcast %cst_5 : f32 to vector<16x128xf32>
    %7 = arith.maximumf %5, %6 : vector<16x128xf32>
    %8 = arith.truncf %7 : vector<16x128xf32> to vector<16x128xbf16>
    %c0_6 = arith.constant 0 : index
    %c0_7 = arith.constant 0 : index
    %9 = vector.load %arg4[%c0_6, %c0_7] : memref<128x16xbf16, #tpu.memory_space<vmem>>, vector<128x16xbf16>
    %cst_8 = arith.constant dense<0.000000e+00> : vector<16x16xf32>
    %10 = tpu.matmul %8, %9, %cst_8 {dimension_numbers = #tpu.dot_dimension_numbers<[1], [0], [0], [1], [0, 0, 1, 1], [], []>} : vector<16x128xbf16>, vector<128x16xbf16>, vector<16x16xf32> -> vector<16x16xf32>
    %11 = arith.mulf %10, %10 : vector<16x16xf32>
    %cst_9 = arith.constant dense<0.000000e+00> : vector<16xf32>
    %12 = vector.multi_reduction <add>, %11, %cst_9 [1] : vector<16x16xf32> to vector<16xf32>
    %13 = vector.shape_cast %12 : vector<16xf32> to vector<16x1xf32>
    %cst_10 = arith.constant 1.000000e-24 : f32
    %14 = vector.broadcast %cst_10 : f32 to vector<16x1xf32>
    %15 = arith.maximumf %13, %14 : vector<16x1xf32>
    %16 = math.rsqrt %15 : vector<16x1xf32>
    %17 = vector.broadcast %16 : vector<16x1xf32> to vector<16x16xf32>
    %18 = arith.mulf %10, %17 : vector<16x16xf32>
    %c0_11 = arith.constant 0 : index
    %c0_12 = arith.constant 0 : index
    %19 = vector.load %arg5[%c0_11, %c0_12] : memref<16x16xf32, #tpu.memory_space<vmem>>, vector<16x16xf32>
    tpu.vector_store %arg5[%c0_11, %c0_12], %18 {strides = array<i32>} : memref<16x16xf32, #tpu.memory_space<vmem>>, vector<16x16xf32>,
    return
  }
  func.func @transform_0(%arg0: i32) -> (i32, i32) {
    %c0_i32 = arith.constant 0 : i32
    %c0_i32_0 = arith.constant 0 : i32
    return %arg0, %c0_i32 : i32, i32
  }
  func.func @transform_1(%arg0: i32) -> (i32, i32) {
    %c0_i32 = arith.constant 0 : i32
    %c0_i32_0 = arith.constant 0 : i32
    %c0_i32_1 = arith.constant 0 : i32
    return %c0_i32, %c0_i32_0 : i32, i32
  }
  func.func @transform_2(%arg0: i32) -> (i32, i32) {
    %c0_i32 = arith.constant 0 : i32
    %c0_i32_0 = arith.constant 0 : i32
    %c0_i32_1 = arith.constant 0 : i32
    return %c0_i32, %c0_i32_0 : i32, i32
  }
  func.func @transform_3(%arg0: i32) -> (i32, i32) {
    %c0_i32 = arith.constant 0 : i32
    %c0_i32_0 = arith.constant 0 : i32
    %c0_i32_1 = arith.constant 0 : i32
    return %c0_i32, %c0_i32_0 : i32, i32
  }
  func.func @transform_4(%arg0: i32) -> (i32, i32) {
    %c0_i32 = arith.constant 0 : i32
    %c0_i32_0 = arith.constant 0 : i32
    return %arg0, %c0_i32 : i32, i32
  }
}

module attributes {stable_mosaic.version = 11 : i64} {
  func.func @_projection_head_kernel(%arg0: i32, %arg1: memref<16x32xbf16, #tpu.memory_space<vmem>>, %arg2: memref<32x128xbf16, #tpu.memory_space<vmem>>, %arg3: memref<1x128xf32, #tpu.memory_space<vmem>>, %arg4: memref<128x16xbf16, #tpu.memory_space<vmem>>, %arg5: memref<16x16xf32, #tpu.memory_space<vmem>>) attributes {dimension_semantics = [#tpu.dimension_semantics<parallel>], iteration_bounds = array<i64: 1>, scalar_prefetch = 0 : i64, scratch_operands = 0 : i64, tpu.core_type = #tpu.core_type<tc>, window_params = [{transform_indices = @transform_0, window_bounds = array<i64: 16, 32>}, {pipeline_mode = #tpu.pipeline_mode<synchronous>, transform_indices = @transform_1, window_bounds = array<i64: 32, 128>}, {pipeline_mode = #tpu.pipeline_mode<synchronous>, transform_indices = @transform_2, window_bounds = array<i64: 1, 128>}, {pipeline_mode = #tpu.pipeline_mode<synchronous>, transform_indices = @transform_3, window_bounds = array<i64: 128, 16>}, {transform_indices = @transform_4, window_bounds = array<i64: 16, 16>}]} {
    %c0 = arith.constant 0 : index
    %c0_0 = arith.constant 0 : index
    %0 = vector.load %arg1[%c0, %c0_0] : memref<16x32xbf16, #tpu.memory_space<vmem>>, vector<16x32xbf16>
    %c0_1 = arith.constant 0 : index
    %c0_2 = arith.constant 0 : index
    %1 = vector.load %arg2[%c0_1, %c0_2] : memref<32x128xbf16, #tpu.memory_space<vmem>>, vector<32x128xbf16>
    %cst = arith.constant dense<0.000000e+00> : vector<16x128xf32>
    %2 = tpu.matmul %0, %1, %cst {dimension_numbers = #tpu.dot_dimension_numbers<[1], [0], [0], [1], [0, 0, 1, 1], [], []>} : vector<16x32xbf16>, vector<32x128xbf16>, vector<16x128xf32> -> vector<16x128xf32>
    %c0_3 = arith.constant 0 : index
    %c0_4 = arith.constant 0 : index
    %3 = vector.load %arg3[%c0_3, %c0_4] : memref<1x128xf32, #tpu.memory_space<vmem>>, vector<1x128xf32>
    %4 = vector.broadcast %3 : vector<1x128xf32> to vector<16x128xf32>
    %5 = arith.addf %2, %4 : vector<16x128xf32>
    %cst_5 = arith.constant 0.000000e+00 : f32
    %6 = vector.broadcast %cst_5 : f32 to vector<16x128xf32>
    %7 = arith.maximumf %5, %6 : vector<16x128xf32>
    %8 = arith.truncf %7 : vector<16x128xf32> to vector<16x128xbf16>
    %c0_6 = arith.constant 0 : index
    %c0_7 = arith.constant 0 : index
    %9 = vector.load %arg4[%c0_6, %c0_7] : memref<128x16xbf16, #tpu.memory_space<vmem>>, vector<128x16xbf16>
    %cst_8 = arith.constant dense<0.000000e+00> : vector<16x16xf32>
    %10 = tpu.matmul %8, %9, %cst_8 {dimension_numbers = #tpu.dot_dimension_numbers<[1], [0], [0], [1], [0, 0, 1, 1], [], []>} : vector<16x128xbf16>, vector<128x16xbf16>, vector<16x16xf32> -> vector<16x16xf32>
    %11 = arith.mulf %10, %10 : vector<16x16xf32>
    %cst_9 = arith.constant dense<0.000000e+00> : vector<16xf32>
    %12 = vector.multi_reduction <add>, %11, %cst_9 [1] : vector<16x16xf32> to vector<16xf32>
    %13 = vector.shape_cast %12 : vector<16xf32> to vector<16x1xf32>
    %cst_10 = arith.constant 1.000000e-24 : f32
    %14 = vector.broadcast %cst_10 : f32 to vector<16x1xf32>
    %15 = arith.maximumf %13, %14 : vector<16x1xf32>
    %16 = math.rsqrt %15 : vector<16x1xf32>
    %17 = vector.broadcast %16 : vector<16x1xf32> to vector<16x16xf32>
    %18 = arith.mulf %10, %17 : vector<16x16xf32>
    %c0_11 = arith.constant 0 : index
    %c0_12 = arith.constant 0 : index
    %19 = vector.load %arg5[%c0_11, %c0_12] : memref<16x16xf32, #tpu.memory_space<vmem>>, vector<16x16xf32>
    tpu.vector_store %arg5[%c0_11, %c0_12], %18 {strides = array<i32>} : memref<16x16xf32, #tpu.memory_space<vmem>>, vector<16x16xf32>,
    return
  }
  func.func @transform_0(%arg0: i32) -> (i32, i32) {
    %c0_i32 = arith.constant 0 : i32
    %c0_i32_0 = arith.constant 0 : i32
    return %arg0, %c0_i32 : i32, i32
  }
  func.func @transform_1(%arg0: i32) -> (i32, i32) {
    %c0_i32 = arith.constant 0 : i32
    %c0_i32_0 = arith.constant 0 : i32
    %c0_i32_1 = arith.constant 0 : i32
    return %c0_i32, %c0_i32_0 : i32, i32
  }
  func.func @transform_2(%arg0: i32) -> (i32, i32) {
    %c0_i32 = arith.constant 0 : i32
    %c0_i32_0 = arith.constant 0 : i32
    %c0_i32_1 = arith.constant 0 : i32
    return %c0_i32, %c0_i32_0 : i32, i32
  }
  func.func @transform_3(%arg0: i32) -> (i32, i32) {
    %c0_i32 = arith.constant 0 : i32
    %c0_i32_0 = arith.constant 0 : i32
    %c0_i32_1 = arith.constant 0 : i32
    return %c0_i32, %c0_i32_0 : i32, i32
  }
  func.func @transform_4(%arg0: i32) -> (i32, i32) {
    %c0_i32 = arith.constant 0 : i32
    %c0_i32_0 = arith.constant 0 : i32
    return %arg0, %c0_i32 : i32, i32
  }
}

</mosaic_0001>

<bundles_post_ra>
// kernel: tpu_custom_call.1
= control target key start
LH: loop header
LB: loop body
LE: loop exit
PB: predicated region body
PF: predicated region fallthrough
CT: control target
= control target key end

     0   :  { %s359_s0 = inlined_call_operand.vmem [shape: bf16[16,32], index: 0, kind: input, shape index: {}]   ;;  %s360_s1 = inlined_call_operand.vmem [shape: bf16[32,128], index: 1, kind: input, shape index: {}]   ;;  %s361_s2 = inlined_call_operand.vmem [shape: f32[1,128], index: 2, kind: input, shape index: {}]   ;;  %s362_s3 = inlined_call_operand.vmem [shape: bf16[128,16], index: 3, kind: input, shape index: {}]   ;;  %s363_s4 = inlined_call_operand.hbm [shape: f32[16,16], index: 4, kind: output, shape index: {}]  }
   0x1   :  { %v245_v0 = vld [vmem:[%s360_s1 + $0x8] sm:$0xff]  ;;  %v253_v1 = vld [vmem:[%s362_s3 + $0x38] sm:$0xff]  ;;  %v244_v2 = vld [vmem:[%s360_s1] sm:$0xff] }
   0x2   :  { %56 = vmatpush.bf16.msra.mxu0 %v245_v0  ;;  %131 = vmatpush.bf16.msra.mxu1 %v253_v1  ;;  %v252_v3 = vld [vmem:[%s362_s3 + $0x30] sm:$0xff] }
   0x3   :  { %9 = vsyncpa [#allocation3], 0  ;;  %v243_v4 = vld [vmem:[%s359_s0] sm:$0xff]  ;;  %vm46_vm0 = vcmask 261120   ;;  %v251_v5 = vld [vmem:[%s362_s3 + $0x28] sm:$0xff]  ;;  %vm147_vm1 = vcmask 130048  }
   0x4   :  { %v250_v6 = vld [vmem:[%s362_s3 + $0x20] sm:$0xff]  ;;  %v249_v7 = vld [vmem:[%s362_s3 + $0x18] sm:$0xff]  ;;  %v248_v8 = vld [vmem:[%s362_s3 + $0x10] sm:$0xff]  ;;  %s186_s13 = sshll.u32 %s363_s4, 4  ;;  %s289_s14 = smov 128   ;;  %s187_s13 = int_to_ptr.hbm [resolvable:$true] %s186_s13 }
   0x5   :  { %v247_v9 = vld [vmem:[%s362_s3 + $0x8] sm:$0xff]  ;;  %v246_v10 = vld [vmem:[%s362_s3] sm:$0xff]  ;;  %s290_s15 = smov 8  }
   0x6   :  { %57 = vmatpush.bf16.msra.mxu0 %v244_v2  ;;  %132 = vmatpush.bf16.msra.mxu1 %v252_v3  ;;  %v257_v12 = vld [vmem:[%s361_s2] ss:$0 sm:$0xff]  ;;  %s288_s2 = smov [#allocation2]  }
   0x7   :  { %s184_s3 = sshll.u32 %s288_s2, 4  ;;  %s185_s3 = int_to_ptr.vmem [resolvable:$true] %s184_s3 }
   0x9   :  { %210 = vmatmul.msk.bf16.vlgmr.msra.gmra.mxu0 %vm46_vm0, %v243_v4 }
   0xa   :  { %133 = vmatpush.bf16.msra.mxu1 %v251_v5 }
   0xe   :  { %134 = vmatpush.bf16.msra.mxu1 %v250_v6 }
  0x12   :  { %135 = vmatpush.bf16.msra.mxu1 %v249_v7 }
  0x16   :  { %136 = vmatpush.bf16.msra.mxu1 %v248_v8 }
  0x1a   :  { %137 = vmatpush.bf16.msra.mxu1 %v247_v9 }
  0x1e   :  { %138 = vmatpush.bf16.msra.mxu1 %v246_v10 }
  0x86   :  { %v59_v11 = vpop.f32.mrf.mxu0 }
  0x87   :  { %v60_v13 = vadd.f32 %v257_v12, %v59_v11 }
  0x89   :  { %v64_v16 = vmax.f32 %v60_v13, 0.0 }
  0x8e   :  { %v61_v14 = vpop.f32.mrf.mxu0 }
  0x8f   :  { %v62_v15 = vadd.f32 %v257_v12, %v61_v14 }
  0x91   :  { %v65_v17 = vmax.f32 %v62_v15, 0.0 }
  0x93   :  { %v66_v18 = vpack.c.bf16 %v65_v17, %v64_v16 }
  0x95   :  { %139 = vmatmul.bf16.vlgmr.msra.gmra.mxu1 %v66_v18 }
 0x112   :  { %v140_v19 = vpop.f32.mrf.mxu1 }
 0x113   :  { %v145_v20 = vmul.f32 %v140_v19, %v140_v19 }
 0x115   :  { %v148_v21 = vsel %vm147_vm1, %v145_v20, 0.0 }
 0x116   :  { %149 = vadd.xlane.f32.xlu0 %v148_v21 }
 0x11a   :  { %v142_v22 = vpop.f32.mrf.mxu1 }
 0x11b   :  { %v146_v23 = vmul.f32 %v142_v22, %v142_v22 }
 0x11d   :  { %v151_v24 = vsel %vm147_vm1, %v146_v23, 0.0 }
 0x11e   :  { %152 = vadd.xlane.f32.xlu0 %v151_v24 }
 0x189   :  { %v150_v25 = vpop.xlane.xlu0 %149 }
 0x18a   :  { %v154_v26 = vmax.f32 %v150_v25, 1e-24 }
 0x18c   :  { %258 = vrsqrt.f32 %v154_v26  ;;  %vm162_vm3 = vweird.f32 %v154_v26 }
 0x191   :  { %v153_v27 = vpop.xlane.xlu0 %152 }
 0x192   :  { %v259_v28 = vpop.eup %258  ;;  %v155_v29 = vmax.f32 %v153_v27, 1e-24 }
 0x193   :  { %v157_v30 = vmul.f32 %v259_v28, %v154_v26  ;;  %vm163_vm2 = vweird.f32 %v259_v28 }
 0x194   :  { %260 = vrsqrt.f32 %v155_v29  ;;  %vm164_vm4 = vmor %vm162_vm3, %vm163_vm2  ;;  %vm172_vm6 = vweird.f32 %v155_v29 }
 0x195   :  { %v158_v31 = vmul.f32 %v259_v28, %v157_v30 }
 0x197   :  { %v159_v32 = vmul.f32 0.5, %v158_v31 }
 0x199   :  { %v160_v33 = vsub.f32 1.5, %v159_v32 }
 0x19a   :  { %v261_v34 = vpop.eup %260 }
 0x19b   :  { %v161_v35 = vmul.f32 %v259_v28, %v160_v33  ;;  %v167_v36 = vmul.f32 %v261_v34, %v155_v29  ;;  %vm173_vm5 = vweird.f32 %v261_v34 }
 0x19c   :  { %vm174_vm7 = vmor %vm172_vm6, %vm173_vm5 }
 0x19d   :  { %v165_v37 = vsel %vm164_vm4, %v259_v28, %v161_v35  ;;  %v168_v38 = vmul.f32 %v261_v34, %v167_v36 }
 0x19e   :  { %v176_v39 = vmul.f32 %v165_v37, %v140_v19 }
 0x19f   :  { %v169_v40 = vmul.f32 0.5, %v168_v38 }
 0x1a0   :  { %178 = vst.msk [vmem:[#allocation2] sm:$0xff] %vm147_vm1, %v176_v39 }
 0x1a1   :  { %v170_v41 = vsub.f32 1.5, %v169_v40 }
 0x1a3   :  { %v171_v42 = vmul.f32 %v261_v34, %v170_v41 }
 0x1a5   :  { %v175_v43 = vsel %vm174_vm7, %v261_v34, %v171_v42 }
 0x1a6   :  { %v177_v44 = vmul.f32 %v175_v43, %v142_v22 }
 0x1a8   :  { %179 = vst.msk [vmem:[#allocation2 + $0x8] sm:$0xff] %vm147_vm1, %v177_v44 }
 0x1a9   :  { %192 = dma.vmem_to_hbm [thread:$0]  %s185_s3, 256, %s187_s13, [#allocation3], %s289_s14, %s289_s14, %s290_s15  }
 0x1aa   :  { %286 = dma.done.wait [#allocation3], 256  }
 0x1ab   :  { %287 = vsyncadd [#allocation3], 4294967040 }
 0x1ac   :  { %197 = vsyncpa [#allocation3], 1 }

// kernel: tpu_custom_call.1
= control target key start
LH: loop header
LB: loop body
LE: loop exit
PB: predicated region body
PF: predicated region fallthrough
CT: control target
= control target key end

     0   :  { %s359_s0 = inlined_call_operand.vmem [shape: bf16[16,32], index: 0, kind: input, shape index: {}]   ;;  %s360_s1 = inlined_call_operand.vmem [shape: bf16[32,128], index: 1, kind: input, shape index: {}]   ;;  %s361_s2 = inlined_call_operand.vmem [shape: f32[1,128], index: 2, kind: input, shape index: {}]   ;;  %s362_s3 = inlined_call_operand.vmem [shape: bf16[128,16], index: 3, kind: input, shape index: {}]   ;;  %s363_s4 = inlined_call_operand.hbm [shape: f32[16,16], index: 4, kind: output, shape index: {}]  }
   0x1   :  { %v245_v0 = vld [vmem:[%s360_s1 + $0x8] sm:$0xff]  ;;  %v253_v1 = vld [vmem:[%s362_s3 + $0x38] sm:$0xff]  ;;  %v244_v2 = vld [vmem:[%s360_s1] sm:$0xff] }
   0x2   :  { %56 = vmatpush.bf16.msra.mxu0 %v245_v0  ;;  %131 = vmatpush.bf16.msra.mxu1 %v253_v1  ;;  %v252_v3 = vld [vmem:[%s362_s3 + $0x30] sm:$0xff] }
   0x3   :  { %9 = vsyncpa [#allocation3], 0  ;;  %v243_v4 = vld [vmem:[%s359_s0] sm:$0xff]  ;;  %vm46_vm0 = vcmask 261120   ;;  %v251_v5 = vld [vmem:[%s362_s3 + $0x28] sm:$0xff]  ;;  %vm147_vm1 = vcmask 130048  }
   0x4   :  { %v250_v6 = vld [vmem:[%s362_s3 + $0x20] sm:$0xff]  ;;  %v249_v7 = vld [vmem:[%s362_s3 + $0x18] sm:$0xff]  ;;  %v248_v8 = vld [vmem:[%s362_s3 + $0x10] sm:$0xff]  ;;  %s186_s13 = sshll.u32 %s363_s4, 4  ;;  %s289_s14 = smov 128   ;;  %s187_s13 = int_to_ptr.hbm [resolvable:$true] %s186_s13 }
   0x5   :  { %v247_v9 = vld [vmem:[%s362_s3 + $0x8] sm:$0xff]  ;;  %v246_v10 = vld [vmem:[%s362_s3] sm:$0xff]  ;;  %s290_s15 = smov 8  }
   0x6   :  { %57 = vmatpush.bf16.msra.mxu0 %v244_v2  ;;  %132 = vmatpush.bf16.msra.mxu1 %v252_v3  ;;  %v257_v12 = vld [vmem:[%s361_s2] ss:$0 sm:$0xff]  ;;  %s288_s2 = smov [#allocation2]  }
   0x7   :  { %s184_s3 = sshll.u32 %s288_s2, 4  ;;  %s185_s3 = int_to_ptr.vmem [resolvable:$true] %s184_s3 }
   0x9   :  { %210 = vmatmul.msk.bf16.vlgmr.msra.gmra.mxu0 %vm46_vm0, %v243_v4 }
   0xa   :  { %133 = vmatpush.bf16.msra.mxu1 %v251_v5 }
   0xe   :  { %134 = vmatpush.bf16.msra.mxu1 %v250_v6 }
  0x12   :  { %135 = vmatpush.bf16.msra.mxu1 %v249_v7 }
  0x16   :  { %136 = vmatpush.bf16.msra.mxu1 %v248_v8 }
  0x1a   :  { %137 = vmatpush.bf16.msra.mxu1 %v247_v9 }
  0x1e   :  { %138 = vmatpush.bf16.msra.mxu1 %v246_v10 }
  0x86   :  { %v59_v11 = vpop.f32.mrf.mxu0 }
  0x87   :  { %v60_v13 = vadd.f32 %v257_v12, %v59_v11 }
  0x89   :  { %v64_v16 = vmax.f32 %v60_v13, 0.0 }
  0x8e   :  { %v61_v14 = vpop.f32.mrf.mxu0 }
  0x8f   :  { %v62_v15 = vadd.f32 %v257_v12, %v61_v14 }
  0x91   :  { %v65_v17 = vmax.f32 %v62_v15, 0.0 }
  0x93   :  { %v66_v18 = vpack.c.bf16 %v65_v17, %v64_v16 }
  0x95   :  { %139 = vmatmul.bf16.vlgmr.msra.gmra.mxu1 %v66_v18 }
 0x112   :  { %v140_v19 = vpop.f32.mrf.mxu1 }
 0x113   :  { %v145_v20 = vmul.f32 %v140_v19, %v140_v19 }
 0x115   :  { %v148_v21 = vsel %vm147_vm1, %v145_v20, 0.0 }
 0x116   :  { %149 = vadd.xlane.f32.xlu0 %v148_v21 }
 0x11a   :  { %v142_v22 = vpop.f32.mrf.mxu1 }
 0x11b   :  { %v146_v23 = vmul.f32 %v142_v22, %v142_v22 }
 0x11d   :  { %v151_v24 = vsel %vm147_vm1, %v146_v23, 0.0 }
 0x11e   :  { %152 = vadd.xlane.f32.xlu0 %v151_v24 }
 0x189   :  { %v150_v25 = vpop.xlane.xlu0 %149 }
 0x18a   :  { %v154_v26 = vmax.f32 %v150_v25, 1e-24 }
 0x18c   :  { %258 = vrsqrt.f32 %v154_v26  ;;  %vm162_vm3 = vweird.f32 %v154_v26 }
 0x191   :  { %v153_v27 = vpop.xlane.xlu0 %152 }
 0x192   :  { %v259_v28 = vpop.eup %258  ;;  %v155_v29 = vmax.f32 %v153_v27, 1e-24 }
 0x193   :  { %v157_v30 = vmul.f32 %v259_v28, %v154_v26  ;;  %vm163_vm2 = vweird.f32 %v259_v28 }
 0x194   :  { %260 = vrsqrt.f32 %v155_v29  ;;  %vm164_vm4 = vmor %vm162_vm3, %vm163_vm2  ;;  %vm172_vm6 = vweird.f32 %v155_v29 }
 0x195   :  { %v158_v31 = vmul.f32 %v259_v28, %v157_v30 }
 0x197   :  { %v159_v32 = vmul.f32 0.5, %v158_v31 }
 0x199   :  { %v160_v33 = vsub.f32 1.5, %v159_v32 }
 0x19a   :  { %v261_v34 = vpop.eup %260 }
 0x19b   :  { %v161_v35 = vmul.f32 %v259_v28, %v160_v33  ;;  %v167_v36 = vmul.f32 %v261_v34, %v155_v29  ;;  %vm173_vm5 = vweird.f32 %v261_v34 }
 0x19c   :  { %vm174_vm7 = vmor %vm172_vm6, %vm173_vm5 }
 0x19d   :  { %v165_v37 = vsel %vm164_vm4, %v259_v28, %v161_v35  ;;  %v168_v38 = vmul.f32 %v261_v34, %v167_v36 }
 0x19e   :  { %v176_v39 = vmul.f32 %v165_v37, %v140_v19 }
 0x19f   :  { %v169_v40 = vmul.f32 0.5, %v168_v38 }
 0x1a0   :  { %178 = vst.msk [vmem:[#allocation2] sm:$0xff] %vm147_vm1, %v176_v39 }
 0x1a1   :  { %v170_v41 = vsub.f32 1.5, %v169_v40 }
 0x1a3   :  { %v171_v42 = vmul.f32 %v261_v34, %v170_v41 }
 0x1a5   :  { %v175_v43 = vsel %vm174_vm7, %v261_v34, %v171_v42 }
 0x1a6   :  { %v177_v44 = vmul.f32 %v175_v43, %v142_v22 }
 0x1a8   :  { %179 = vst.msk [vmem:[#allocation2 + $0x8] sm:$0xff] %vm147_vm1, %v177_v44 }
 0x1a9   :  { %192 = dma.vmem_to_hbm [thread:$0]  %s185_s3, 256, %s187_s13, [#allocation3], %s289_s14, %s289_s14, %s290_s15  }
 0x1aa   :  { %286 = dma.done.wait [#allocation3], 256  }
 0x1ab   :  { %287 = vsyncadd [#allocation3], 4294967040 }
 0x1ac   :  { %197 = vsyncpa [#allocation3], 1 }

</bundles_post_ra>
